<compile_context>
chip_gen: v5e
topology: v5e:2x2
jax: 0.10.0
libtpu: 0.0.40
codegen_flags: <defaults>
</compile_context>

<pallas_src>
import functools
import numpy as np
import jax
import jax.numpy as jnp
from jax import lax
from jax.experimental import pallas as pl
from jax.experimental.pallas import tpu as pltpu


# ------------------------------------------------------------------ utilities
def _layer_norm(x, gamma, beta, eps):
    # x: (S, D), gamma/beta: (1, D)
    mean = jnp.mean(x, axis=-1, keepdims=True)
    var = jnp.mean((x - mean) ** 2, axis=-1, keepdims=True)
    return (x - mean) * lax.rsqrt(var + eps) * gamma + beta


def sinusoidal_pos_enc(dim, positions):
    # matches pos_enc.get_pos_enc semantics
    pos = np.arange(positions)[:, None].astype(np.float64)
    i = np.arange(dim)[None, :].astype(np.float64)
    angles = pos / np.power(10000.0, (2.0 * (i // 2)) / dim)
    angles[:, 0::2] = np.sin(angles[:, 0::2])
    angles[:, 1::2] = np.cos(angles[:, 1::2])
    return jnp.asarray(angles, dtype=jnp.float32)  # (positions, dim)


# ------------------------------------------------------------------ fused kernel
def fused_encoder_kernel(emb_ref, pos_ref, png_ref, pnb_ref, mask_ref,
                         wqkv_ref, wo_ref, ln1g_ref, ln1b_ref,
                         w1_ref, b1_ref, w2_ref, b2_ref,
                         ln2g_ref, ln2b_ref,
                         o_ref, attn_sc, *, n_heads, dk, dv):
    l = pl.program_id(1)
    hdk = n_heads * dk

    # ---- layer step 0: prelude (pos-enc add + dropout(identity) + LN eps=1e-9)
    @pl.when(l == 0)
    def _():
        # TODO(synk): dropout is identity (inference mode); no in-kernel RNG dropout.
        x0 = emb_ref[0] + pos_ref[...]
        o_ref[0] = _layer_norm(x0, png_ref[...], pnb_ref[...], 1e-9)

    x = o_ref[0]                        # (S, D) — resident in VMEM across layers
    mask = mask_ref[0]                  # (1, S), 1.0 = keep, 0.0 = pad

    # ---- multi-head self-attention: one fused QKV matmul
    qkv = jnp.dot(x, wqkv_ref[0], preferred_element_type=jnp.float32)  # (S, 2*hdk+hdv)
    q = qkv[:, :hdk] * (1.0 / (dk ** 0.5))     # fold 1/sqrt(dk) into q (S x hdk mul)
    k = qkv[:, hdk:2 * hdk]
    v = qkv[:, 2 * hdk:]

    for h in range(n_heads):                   # static unroll over heads
        qh = q[:, h * dk:(h + 1) * dk]
        kh = k[:, h * dk:(h + 1) * dk]
        vh = v[:, h * dv:(h + 1) * dv]
        # contract last dims directly — no kh.T / XLU transpose
        s = lax.dot_general(qh, kh, (((1,), (1,)), ((), ())),
                            preferred_element_type=jnp.float32)        # (S, S)
        s = jnp.where(mask > 0.0, s, -1e9)     # key mask broadcast over query rows
        s = s - jnp.max(s, axis=-1, keepdims=True)
        p = jnp.exp(s)
        p = p * pl.reciprocal(jnp.sum(p, axis=-1, keepdims=True), approx=True)
        attn_sc[:, h * dv:(h + 1) * dv] = jnp.dot(
            p, vh, preferred_element_type=jnp.float32)                 # (S, dv)

    attn_out = jnp.dot(attn_sc[...], wo_ref[0], preferred_element_type=jnp.float32)

    # residual + post-LN (eps=1e-6)
    x1 = _layer_norm(x + attn_out, ln1g_ref[0], ln1b_ref[0], 1e-6)

    # position-wise FFN
    h1 = jnp.maximum(
        jnp.dot(x1, w1_ref[0], preferred_element_type=jnp.float32) + b1_ref[0], 0.0)
    y = jnp.dot(h1, w2_ref[0], preferred_element_type=jnp.float32) + b2_ref[0]
    o_ref[0] = _layer_norm(x1 + y, ln2g_ref[0], ln2b_ref[0], 1e-6)


# ------------------------------------------------------------------ wrapper
def encoder_forward(inp_seq, params, *, n_heads, dk, dv, scale_emb=False):
    D = params["embedding"].shape[1]
    # embedding gather (glue in plain JAX)
    emb = jnp.take(params["embedding"], inp_seq, axis=0).astype(jnp.float32)  # (B,S,D)
    if scale_emb:
        emb = emb * (D ** 0.5)
    B, S = inp_seq.shape
    pos = params["pos_enc"][:S]                                               # (S, D)
    mask = (inp_seq != params["pad_idx"]).astype(jnp.float32)[:, None, :]     # (B,1,S)

    layers = params["layers"]
    L = len(layers)
    hdk = n_heads * dk
    hdv = n_heads * dv
    hidden = layers[0]["w1"].shape[1]
    qkv_w = 2 * hdk + hdv

    # stack per-layer weights along a leading layer axis; fuse q|k|v columns
    wqkv = jnp.stack([jnp.concatenate([lp["wq"], lp["wk"], lp["wv"]], axis=1)
                      for lp in layers])                                       # (L, D, qkv_w)
    wo = jnp.stack([lp["wo"] for lp in layers])                                # (L, hdv, D)
    ln1g = jnp.stack([lp["ln1_g"] for lp in layers])                           # (L, 1, D)
    ln1b = jnp.stack([lp["ln1_b"] for lp in layers])
    w1 = jnp.stack([lp["w1"] for lp in layers])                                # (L, D, hidden)
    b1 = jnp.stack([lp["b1"] for lp in layers])                                # (L, 1, hidden)
    w2 = jnp.stack([lp["w2"] for lp in layers])                                # (L, hidden, D)
    b2 = jnp.stack([lp["b2"] for lp in layers])                                # (L, 1, D)
    ln2g = jnp.stack([lp["ln2_g"] for lp in layers])
    ln2b = jnp.stack([lp["ln2_b"] for lp in layers])

    kern = functools.partial(fused_encoder_kernel, n_heads=n_heads, dk=dk, dv=dv)
    per_layer = lambda shape: pl.BlockSpec((1,) + shape, lambda b, l: (l, 0, 0))
    const2d = lambda shape: pl.BlockSpec(shape, lambda b, l: (0, 0))

    return pl.pallas_call(
        kern,
        out_shape=jax.ShapeDtypeStruct((B, S, D), jnp.float32),
        grid_spec=pltpu.PrefetchScalarGridSpec(
            num_scalar_prefetch=0,
            grid=(B, L),                                   # layer axis last (inner loop)
            in_specs=[
                pl.BlockSpec((1, S, D), lambda b, l: (b, 0, 0)),   # emb (read at l==0)
                const2d((S, D)),                                   # pos enc
                const2d((1, D)), const2d((1, D)),                  # prelude LN gamma/beta
                pl.BlockSpec((1, 1, S), lambda b, l: (b, 0, 0)),   # key mask
                per_layer((D, qkv_w)),                             # fused wqkv
                per_layer((hdv, D)),                               # wo
                per_layer((1, D)), per_layer((1, D)),              # ln1 gamma/beta
                per_layer((D, hidden)), per_layer((1, hidden)),    # w1, b1
                per_layer((hidden, D)), per_layer((1, D)),         # w2, b2
                per_layer((1, D)), per_layer((1, D)),              # ln2 gamma/beta
            ],
            # same block across the layer axis -> x stays resident in VMEM
            out_specs=pl.BlockSpec((1, S, D), lambda b, l: (b, 0, 0)),
            scratch_shapes=[pltpu.VMEM((S, hdv), jnp.float32)],    # per-head output slab
        ),
        compiler_params=pltpu.CompilerParams(
            dimension_semantics=("parallel", "arbitrary"),
        ),
    )(emb, pos, params["ln_g"], params["ln_b"], mask,
      wqkv, wo, ln1g, ln1b, w1, b1, w2, b2, ln2g, ln2b)


# ------------------------------------------------------------------ pure-JAX reference
def encoder_ref(inp_seq, params, *, n_heads, dk, dv, scale_emb=False):
    D = params["embedding"].shape[1]
    x = jnp.take(params["embedding"], inp_seq, axis=0)
    if scale_emb:
        x = x * (D ** 0.5)
    x = x + params["pos_enc"][: inp_seq.shape[1]][None]
    mask = (inp_seq != params["pad_idx"])[:, None, None, :]  # (B,1,1,S)

    def ln(v, g, b, eps):
        m = v.mean(-1, keepdims=True)
        s = ((v - m) ** 2).mean(-1, keepdims=True)
        return (v - m) / jnp.sqrt(s + eps) * g + b

    x = ln(x, params["ln_g"][0], params["ln_b"][0], 1e-9)
    B, S, _ = x.shape
    for lp in params["layers"]:
        q = (x @ lp["wq"]).reshape(B, S, n_heads, dk).transpose(0, 2, 1, 3)
        k = (x @ lp["wk"]).reshape(B, S, n_heads, dk).transpose(0, 2, 1, 3)
        v = (x @ lp["wv"]).reshape(B, S, n_heads, dv).transpose(0, 2, 1, 3)
        s = jnp.einsum("bhqd,bhkd->bhqk", q, k) / (dk ** 0.5)
        s = jnp.where(mask, s, -1e9)
        p = jax.nn.softmax(s, axis=-1)
        o = jnp.einsum("bhqk,bhkd->bhqd", p, v).transpose(0, 2, 1, 3).reshape(B, S, -1)
        x1 = ln(x + o @ lp["wo"], lp["ln1_g"][0], lp["ln1_b"][0], 1e-6)
        f = jnp.maximum(x1 @ lp["w1"] + lp["b1"][0], 0.0) @ lp["w2"] + lp["b2"][0]
        x = ln(x1 + f, lp["ln2_g"][0], lp["ln2_b"][0], 1e-6)
    return x


# ------------------------------------------------------------------ main
if __name__ == "__main__":
    # small config consistent with Encoder.__init__
    src_vocab_len, embd_dim, pad_idx = 50, 32, 0
    n_layers, n_heads, dk, dv, hidden_dim = 2, 2, 16, 16, 64
    seq_len, B, S = 200, 2, 8

    key = jax.random.PRNGKey(0)
    keys = iter(jax.random.split(key, 64))

    def rnd(shape, scale=0.05):
        return (scale * jax.random.normal(next(keys), shape)).astype(jnp.float32)

    embedding = rnd((src_vocab_len, embd_dim), 1.0)
    embedding = embedding.at[pad_idx].set(0.0)  # padding_idx row is zero

    layers = []
    for _ in range(n_layers):
        layers.append(dict(
            wq=rnd((embd_dim, n_heads * dk)), wk=rnd((embd_dim, n_heads * dk)),
            wv=rnd((embd_dim, n_heads * dv)), wo=rnd((n_heads * dv, embd_dim)),
            ln1_g=jnp.ones((1, embd_dim), jnp.float32), ln1_b=jnp.zeros((1, embd_dim), jnp.float32),
            w1=rnd((embd_dim, hidden_dim)), b1=jnp.zeros((1, hidden_dim), jnp.float32),
            w2=rnd((hidden_dim, embd_dim)), b2=jnp.zeros((1, embd_dim), jnp.float32),
            ln2_g=jnp.ones((1, embd_dim), jnp.float32), ln2_b=jnp.zeros((1, embd_dim), jnp.float32),
        ))

    params = dict(
        embedding=embedding,
        pos_enc=sinusoidal_pos_enc(embd_dim, seq_len),
        ln_g=jnp.ones((1, embd_dim), jnp.float32),
        ln_b=jnp.zeros((1, embd_dim), jnp.float32),
        layers=layers,
        pad_idx=pad_idx,
    )

    inp_seq = jax.random.randint(next(keys), (B, S), 1, src_vocab_len, dtype=jnp.int32)
    inp_seq = inp_seq.at[1, -2:].set(pad_idx)  # include some padding

    out = encoder_forward(inp_seq, params, n_heads=n_heads, dk=dk, dv=dv, scale_emb=False)
    out = jax.block_until_ready(out)

    ref = encoder_ref(inp_seq, params, n_heads=n_heads, dk=dk, dv=dv, scale_emb=False)
    assert out.shape == (B, S, embd_dim)
    np.testing.assert_allclose(np.asarray(out), np.asarray(ref), rtol=2e-3, atol=2e-3)
    print("KERNEL_OK")
</pallas_src>

<mosaic_0001>
module attributes {stable_mosaic.version = 11 : i64} {
  func.func @fused_encoder_kernel(%arg0: i32, %arg1: i32, %arg2: memref<1x8x32xf32, #tpu.memory_space<vmem>>, %arg3: memref<8x32xf32, #tpu.memory_space<vmem>>, %arg4: memref<1x32xf32, #tpu.memory_space<vmem>>, %arg5: memref<1x32xf32, #tpu.memory_space<vmem>>, %arg6: memref<1x1x8xf32, #tpu.memory_space<vmem>>, %arg7: memref<1x32x96xf32, #tpu.memory_space<vmem>>, %arg8: memref<1x32x32xf32, #tpu.memory_space<vmem>>, %arg9: memref<1x1x32xf32, #tpu.memory_space<vmem>>, %arg10: memref<1x1x32xf32, #tpu.memory_space<vmem>>, %arg11: memref<1x32x64xf32, #tpu.memory_space<vmem>>, %arg12: memref<1x1x64xf32, #tpu.memory_space<vmem>>, %arg13: memref<1x64x32xf32, #tpu.memory_space<vmem>>, %arg14: memref<1x1x32xf32, #tpu.memory_space<vmem>>, %arg15: memref<1x1x32xf32, #tpu.memory_space<vmem>>, %arg16: memref<1x1x32xf32, #tpu.memory_space<vmem>>, %arg17: memref<1x8x32xf32, #tpu.memory_space<vmem>>, %arg18: memref<8x32xf32, #tpu.memory_space<vmem>>) attributes {dimension_semantics = [#tpu.dimension_semantics<parallel>, #tpu.dimension_semantics<arbitrary>], iteration_bounds = array<i64: 2, 2>, scalar_prefetch = 0 : i64, scratch_operands = 1 : i64, tpu.core_type = #tpu.core_type<tc>, window_params = [{transform_indices = @transform_0, window_bounds = array<i64: 1, 8, 32>}, {pipeline_mode = #tpu.pipeline_mode<synchronous>, transform_indices = @transform_1, window_bounds = array<i64: 8, 32>}, {pipeline_mode = #tpu.pipeline_mode<synchronous>, transform_indices = @transform_2, window_bounds = array<i64: 1, 32>}, {pipeline_mode = #tpu.pipeline_mode<synchronous>, transform_indices = @transform_3, window_bounds = array<i64: 1, 32>}, {transform_indices = @transform_4, window_bounds = array<i64: 1, 1, 8>}, {transform_indices = @transform_5, window_bounds = array<i64: 1, 32, 96>}, {transform_indices = @transform_6, window_bounds = array<i64: 1, 32, 32>}, {transform_indices = @transform_7, window_bounds = array<i64: 1, 1, 32>}, {transform_indices = @transform_8, window_bounds = array<i64: 1, 1, 32>}, {transform_indices = @transform_9, window_bounds = array<i64: 1, 32, 64>}, {transform_indices = @transform_10, window_bounds = array<i64: 1, 1, 64>}, {transform_indices = @transform_11, window_bounds = array<i64: 1, 64, 32>}, {transform_indices = @transform_12, window_bounds = array<i64: 1, 1, 32>}, {transform_indices = @transform_13, window_bounds = array<i64: 1, 1, 32>}, {transform_indices = @transform_14, window_bounds = array<i64: 1, 1, 32>}, {transform_indices = @transform_15, window_bounds = array<i64: 1, 8, 32>}]} {
    %c0_i32 = arith.constant 0 : i32
    %0 = arith.cmpi eq, %arg1, %c0_i32 : i32
    %1 = arith.extui %0 : i1 to i32
    %c0_i32_0 = arith.constant 0 : i32
    %2 = arith.cmpi ne, %1, %c0_i32_0 : i32
    scf.if %2 {
      %c0_71 = arith.constant 0 : index
      %c0_72 = arith.constant 0 : index
      %c0_73 = arith.constant 0 : index
      %136 = vector.load %arg2[%c0_71, %c0_72, %c0_73] : memref<1x8x32xf32, #tpu.memory_space<vmem>>, vector<1x8x32xf32>
      %137 = vector.shape_cast %136 : vector<1x8x32xf32> to vector<8x32xf32>
      %c0_74 = arith.constant 0 : index
      %c0_75 = arith.constant 0 : index
      %138 = vector.load %arg3[%c0_74, %c0_75] : memref<8x32xf32, #tpu.memory_space<vmem>>, vector<8x32xf32>
      %139 = arith.addf %137, %138 : vector<8x32xf32>
      %c0_76 = arith.constant 0 : index
      %c0_77 = arith.constant 0 : index
      %140 = vector.load %arg4[%c0_76, %c0_77] : memref<1x32xf32, #tpu.memory_space<vmem>>, vector<1x32xf32>
      %c0_78 = arith.constant 0 : index
      %c0_79 = arith.constant 0 : index
      %141 = vector.load %arg5[%c0_78, %c0_79] : memref<1x32xf32, #tpu.memory_space<vmem>>, vector<1x32xf32>
      %cst_80 = arith.constant dense<0.000000e+00> : vector<8xf32>
      %142 = vector.multi_reduction <add>, %139, %cst_80 [1] : vector<8x32xf32> to vector<8xf32>
      %143 = vector.shape_cast %142 : vector<8xf32> to vector<8x1xf32>
      %cst_81 = arith.constant 3.200000e+01 : f32
      %144 = vector.broadcast %cst_81 : f32 to vector<8x1xf32>
      %145 = arith.divf %143, %144 : vector<8x1xf32>
      %146 = vector.broadcast %145 : vector<8x1xf32> to vector<8x32xf32>
      %147 = arith.subf %139, %146 : vector<8x32xf32>
      %148 = arith.mulf %147, %147 : vector<8x32xf32>
      %cst_82 = arith.constant dense<0.000000e+00> : vector<8xf32>
      %149 = vector.multi_reduction <add>, %148, %cst_82 [1] : vector<8x32xf32> to vector<8xf32>
      %150 = vector.shape_cast %149 : vector<8xf32> to vector<8x1xf32>
      %cst_83 = arith.constant 3.200000e+01 : f32
      %151 = vector.broadcast %cst_83 : f32 to vector<8x1xf32>
      %152 = arith.divf %150, %151 : vector<8x1xf32>
      %153 = vector.broadcast %145 : vector<8x1xf32> to vector<8x32xf32>
      %154 = arith.subf %139, %153 : vector<8x32xf32>
      %cst_84 = arith.constant 9.99999971E-10 : f32
      %155 = vector.broadcast %cst_84 : f32 to vector<8x1xf32>
      %156 = arith.addf %152, %155 : vector<8x1xf32>
      %157 = math.rsqrt %156 : vector<8x1xf32>
      %158 = vector.broadcast %157 : vector<8x1xf32> to vector<8x32xf32>
      %159 = arith.mulf %154, %158 : vector<8x32xf32>
      %160 = vector.broadcast %140 : vector<1x32xf32> to vector<8x32xf32>
      %161 = arith.mulf %159, %160 : vector<8x32xf32>
      %162 = vector.broadcast %141 : vector<1x32xf32> to vector<8x32xf32>
      %163 = arith.addf %161, %162 : vector<8x32xf32>
      %c0_85 = arith.constant 0 : index
      %c0_86 = arith.constant 0 : index
      %c0_87 = arith.constant 0 : index
      %164 = vector.load %arg17[%c0_85, %c0_86, %c0_87] : memref<1x8x32xf32, #tpu.memory_space<vmem>>, vector<1x8x32xf32>
      %165 = vector.shape_cast %164 : vector<1x8x32xf32> to vector<8x32xf32>
      %166 = vector.shape_cast %163 : vector<8x32xf32> to vector<1x8x32xf32>
      tpu.vector_store %arg17[%c0_85, %c0_86, %c0_87], %166 {strides = array<i32>} : memref<1x8x32xf32, #tpu.memory_space<vmem>>, vector<1x8x32xf32>,
    } else {
    }
    %c0 = arith.constant 0 : index
    %c0_1 = arith.constant 0 : index
    %c0_2 = arith.constant 0 : index
    %3 = vector.load %arg17[%c0, %c0_1, %c0_2] : memref<1x8x32xf32, #tpu.memory_space<vmem>>, vector<1x8x32xf32>
    %4 = vector.shape_cast %3 : vector<1x8x32xf32> to vector<8x32xf32>
    %c0_3 = arith.constant 0 : index
    %c0_4 = arith.constant 0 : index
    %c0_5 = arith.constant 0 : index
    %5 = vector.load %arg6[%c0_3, %c0_4, %c0_5] : memref<1x1x8xf32, #tpu.memory_space<vmem>>, vector<1x1x8xf32>
    %6 = vector.shape_cast %5 : vector<1x1x8xf32> to vector<1x8xf32>
    %c0_6 = arith.constant 0 : index
    %c0_7 = arith.constant 0 : index
    %c0_8 = arith.constant 0 : index
    %7 = vector.load %arg7[%c0_6, %c0_7, %c0_8] : memref<1x32x96xf32, #tpu.memory_space<vmem>>, vector<1x32x96xf32>
    %8 = vector.shape_cast %7 : vector<1x32x96xf32> to vector<32x96xf32>
    %cst = arith.constant dense<0.000000e+00> : vector<8x96xf32>
    %9 = tpu.matmul %4, %8, %cst {dimension_numbers = #tpu.dot_dimension_numbers<[1], [0], [0], [1], [0, 0, 1, 1], [], []>} : vector<8x32xf32>, vector<32x96xf32>, vector<8x96xf32> -> vector<8x96xf32>
    %10 = vector.extract_strided_slice %9 {offsets = [0, 0], sizes = [8, 32], strides = [1, 1]} : vector<8x96xf32> to vector<8x32xf32>
    %cst_9 = arith.constant 2.500000e-01 : f32
    %11 = vector.broadcast %cst_9 : f32 to vector<8x32xf32>
    %12 = arith.mulf %10, %11 : vector<8x32xf32>
    %13 = vector.extract_strided_slice %9 {offsets = [0, 32], sizes = [8, 32], strides = [1, 1]} : vector<8x96xf32> to vector<8x32xf32>
    %14 = vector.extract_strided_slice %9 {offsets = [0, 64], sizes = [8, 32], strides = [1, 1]} : vector<8x96xf32> to vector<8x32xf32>
    %15 = vector.extract_strided_slice %12 {offsets = [0, 0], sizes = [8, 16], strides = [1, 1]} : vector<8x32xf32> to vector<8x16xf32>
    %16 = vector.extract_strided_slice %13 {offsets = [0, 0], sizes = [8, 16], strides = [1, 1]} : vector<8x32xf32> to vector<8x16xf32>
    %17 = vector.extract_strided_slice %14 {offsets = [0, 0], sizes = [8, 16], strides = [1, 1]} : vector<8x32xf32> to vector<8x16xf32>
    %cst_10 = arith.constant dense<0.000000e+00> : vector<8x8xf32>
    %18 = tpu.matmul %15, %16, %cst_10 {dimension_numbers = #tpu.dot_dimension_numbers<[1], [1], [0], [0], [0, 0, 1, 0], [], []>} : vector<8x16xf32>, vector<8x16xf32>, vector<8x8xf32> -> vector<8x8xf32>
    %cst_11 = arith.constant 0.000000e+00 : f32
    %19 = vector.broadcast %cst_11 : f32 to vector<1x8xf32>
    %20 = arith.cmpf ogt, %6, %19 : vector<1x8xf32>
    %cst_12 = arith.constant -1.000000e+09 : f32
    %21 = vector.shape_cast %20 : vector<1x8xi1> to vector<1x8xi1>
    %22 = vector.broadcast %21 : vector<1x8xi1> to vector<8x8xi1>
    %23 = vector.broadcast %cst_12 : f32 to vector<8x8xf32>
    %24 = arith.select %22, %18, %23 : vector<8x8xi1>, vector<8x8xf32>
    %cst_13 = arith.constant dense<0xFF800000> : vector<8xf32>
    %25 = vector.multi_reduction <maximumf>, %24, %cst_13 [1] : vector<8x8xf32> to vector<8xf32>
    %26 = vector.shape_cast %25 : vector<8xf32> to vector<8x1xf32>
    %27 = vector.broadcast %26 : vector<8x1xf32> to vector<8x8xf32>
    %28 = arith.subf %24, %27 : vector<8x8xf32>
    %29 = math.exp %28 : vector<8x8xf32>
    %cst_14 = arith.constant dense<0.000000e+00> : vector<8xf32>
    %30 = vector.multi_reduction <add>, %29, %cst_14 [1] : vector<8x8xf32> to vector<8xf32>
    %31 = vector.shape_cast %30 : vector<8xf32> to vector<8x1xf32>
    %32 = tpu.reciprocal %31 {approx = true} : vector<8x1xf32> -> vector<8x1xf32>
    %33 = vector.broadcast %32 : vector<8x1xf32> to vector<8x8xf32>
    %34 = arith.mulf %29, %33 : vector<8x8xf32>
    %cst_15 = arith.constant dense<0.000000e+00> : vector<8x16xf32>
    %35 = tpu.matmul %34, %17, %cst_15 {dimension_numbers = #tpu.dot_dimension_numbers<[1], [0], [0], [1], [0, 0, 1, 1], [], []>} : vector<8x8xf32>, vector<8x16xf32>, vector<8x16xf32> -> vector<8x16xf32>
    %c0_16 = arith.constant 0 : index
    %c0_17 = arith.constant 0 : index
    %36 = vector.load %arg18[%c0_16, %c0_17] : memref<8x32xf32, #tpu.memory_space<vmem>>, vector<8x16xf32>
    tpu.vector_store %arg18[%c0_16, %c0_17], %35 {strides = array<i32>} : memref<8x32xf32, #tpu.memory_space<vmem>>, vector<8x16xf32>,
    %37 = vector.extract_strided_slice %12 {offsets = [0, 16], sizes = [8, 16], strides = [1, 1]} : vector<8x32xf32> to vector<8x16xf32>
    %38 = vector.extract_strided_slice %13 {offsets = [0, 16], sizes = [8, 16], strides = [1, 1]} : vector<8x32xf32> to vector<8x16xf32>
    %39 = vector.extract_strided_slice %14 {offsets = [0, 16], sizes = [8, 16], strides = [1, 1]} : vector<8x32xf32> to vector<8x16xf32>
    %cst_18 = arith.constant dense<0.000000e+00> : vector<8x8xf32>
    %40 = tpu.matmul %37, %38, %cst_18 {dimension_numbers = #tpu.dot_dimension_numbers<[1], [1], [0], [0], [0, 0, 1, 0], [], []>} : vector<8x16xf32>, vector<8x16xf32>, vector<8x8xf32> -> vector<8x8xf32>
    %cst_19 = arith.constant 0.000000e+00 : f32
    %41 = vector.broadcast %cst_19 : f32 to vector<1x8xf32>
    %42 = arith.cmpf ogt, %6, %41 : vector<1x8xf32>
    %cst_20 = arith.constant -1.000000e+09 : f32
    %43 = vector.shape_cast %42 : vector<1x8xi1> to vector<1x8xi1>
    %44 = vector.broadcast %43 : vector<1x8xi1> to vector<8x8xi1>
    %45 = vector.broadcast %cst_20 : f32 to vector<8x8xf32>
    %46 = arith.select %44, %40, %45 : vector<8x8xi1>, vector<8x8xf32>
    %cst_21 = arith.constant dense<0xFF800000> : vector<8xf32>
    %47 = vector.multi_reduction <maximumf>, %46, %cst_21 [1] : vector<8x8xf32> to vector<8xf32>
    %48 = vector.shape_cast %47 : vector<8xf32> to vector<8x1xf32>
    %49 = vector.broadcast %48 : vector<8x1xf32> to vector<8x8xf32>
    %50 = arith.subf %46, %49 : vector<8x8xf32>
    %51 = math.exp %50 : vector<8x8xf32>
    %cst_22 = arith.constant dense<0.000000e+00> : vector<8xf32>
    %52 = vector.multi_reduction <add>, %51, %cst_22 [1] : vector<8x8xf32> to vector<8xf32>
    %53 = vector.shape_cast %52 : vector<8xf32> to vector<8x1xf32>
    %54 = tpu.reciprocal %53 {approx = true} : vector<8x1xf32> -> vector<8x1xf32>
    %55 = vector.broadcast %54 : vector<8x1xf32> to vector<8x8xf32>
    %56 = arith.mulf %51, %55 : vector<8x8xf32>
    %cst_23 = arith.constant dense<0.000000e+00> : vector<8x16xf32>
    %57 = tpu.matmul %56, %39, %cst_23 {dimension_numbers = #tpu.dot_dimension_numbers<[1], [0], [0], [1], [0, 0, 1, 1], [], []>} : vector<8x8xf32>, vector<8x16xf32>, vector<8x16xf32> -> vector<8x16xf32>
    %c0_24 = arith.constant 0 : index
    %c16 = arith.constant 16 : index
    %58 = vector.load %arg18[%c0_24, %c16] : memref<8x32xf32, #tpu.memory_space<vmem>>, vector<8x16xf32>
    tpu.vector_store %arg18[%c0_24, %c16], %57 {strides = array<i32>} : memref<8x32xf32, #tpu.memory_space<vmem>>, vector<8x16xf32>,
    %c0_25 = arith.constant 0 : index
    %c0_26 = arith.constant 0 : index
    %59 = vector.load %arg18[%c0_25, %c0_26] : memref<8x32xf32, #tpu.memory_space<vmem>>, vector<8x32xf32>
    %c0_27 = arith.constant 0 : index
    %c0_28 = arith.constant 0 : index
    %c0_29 = arith.constant 0 : index
    %60 = vector.load %arg8[%c0_27, %c0_28, %c0_29] : memref<1x32x32xf32, #tpu.memory_space<vmem>>, vector<1x32x32xf32>
    %61 = vector.shape_cast %60 : vector<1x32x32xf32> to vector<32x32xf32>
    %cst_30 = arith.constant dense<0.000000e+00> : vector<8x32xf32>
    %62 = tpu.matmul %59, %61, %cst_30 {dimension_numbers = #tpu.dot_dimension_numbers<[1], [0], [0], [1], [0, 0, 1, 1], [], []>} : vector<8x32xf32>, vector<32x32xf32>, vector<8x32xf32> -> vector<8x32xf32>
    %63 = arith.addf %4, %62 : vector<8x32xf32>
    %c0_31 = arith.constant 0 : index
    %c0_32 = arith.constant 0 : index
    %c0_33 = arith.constant 0 : index
    %64 = vector.load %arg9[%c0_31, %c0_32, %c0_33] : memref<1x1x32xf32, #tpu.memory_space<vmem>>, vector<1x1x32xf32>
    %65 = vector.shape_cast %64 : vector<1x1x32xf32> to vector<1x32xf32>
    %c0_34 = arith.constant 0 : index
    %c0_35 = arith.constant 0 : index
    %c0_36 = arith.constant 0 : index
    %66 = vector.load %arg10[%c0_34, %c0_35, %c0_36] : memref<1x1x32xf32, #tpu.memory_space<vmem>>, vector<1x1x32xf32>
    %67 = vector.shape_cast %66 : vector<1x1x32xf32> to vector<1x32xf32>
    %cst_37 = arith.constant dense<0.000000e+00> : vector<8xf32>
    %68 = vector.multi_reduction <add>, %63, %cst_37 [1] : vector<8x32xf32> to vector<8xf32>
    %69 = vector.shape_cast %68 : vector<8xf32> to vector<8x1xf32>
    %cst_38 = arith.constant 3.200000e+01 : f32
    %70 = vector.broadcast %cst_38 : f32 to vector<8x1xf32>
    %71 = arith.divf %69, %70 : vector<8x1xf32>
    %72 = vector.broadcast %71 : vector<8x1xf32> to vector<8x32xf32>
    %73 = arith.subf %63, %72 : vector<8x32xf32>
    %74 = arith.mulf %73, %73 : vector<8x32xf32>
    %cst_39 = arith.constant dense<0.000000e+00> : vector<8xf32>
    %75 = vector.multi_reduction <add>, %74, %cst_39 [1] : vector<8x32xf32> to vector<8xf32>
    %76 = vector.shape_cast %75 : vector<8xf32> to vector<8x1xf32>
    %cst_40 = arith.constant 3.200000e+01 : f32
    %77 = vector.broadcast %cst_40 : f32 to vector<8x1xf32>
    %78 = arith.divf %76, %77 : vector<8x1xf32>
    %79 = vector.broadcast %71 : vector<8x1xf32> to vector<8x32xf32>
    %80 = arith.subf %63, %79 : vector<8x32xf32>
    %cst_41 = arith.constant 9.99999997E-7 : f32
    %81 = vector.broadcast %cst_41 : f32 to vector<8x1xf32>
    %82 = arith.addf %78, %81 : vector<8x1xf32>
    %83 = math.rsqrt %82 : vector<8x1xf32>
    %84 = vector.broadcast %83 : vector<8x1xf32> to vector<8x32xf32>
    %85 = arith.mulf %80, %84 : vector<8x32xf32>
    %86 = vector.broadcast %65 : vector<1x32xf32> to vector<8x32xf32>
    %87 = arith.mulf %85, %86 : vector<8x32xf32>
    %88 = vector.broadcast %67 : vector<1x32xf32> to vector<8x32xf32>
    %89 = arith.addf %87, %88 : vector<8x32xf32>
    %c0_42 = arith.constant 0 : index
    %c0_43 = arith.constant 0 : index
    %c0_44 = arith.constant 0 : index
    %90 = vector.load %arg11[%c0_42, %c0_43, %c0_44] : memref<1x32x64xf32, #tpu.memory_space<vmem>>, vector<1x32x64xf32>
    %91 = vector.shape_cast %90 : vector<1x32x64xf32> to vector<32x64xf32>
    %cst_45 = arith.constant dense<0.000000e+00> : vector<8x64xf32>
    %92 = tpu.matmul %89, %91, %cst_45 {dimension_numbers = #tpu.dot_dimension_numbers<[1], [0], [0], [1], [0, 0, 1, 1], [], []>} : vector<8x32xf32>, vector<32x64xf32>, vector<8x64xf32> -> vector<8x64xf32>
    %c0_46 = arith.constant 0 : index
    %c0_47 = arith.constant 0 : index
    %c0_48 = arith.constant 0 : index
    %93 = vector.load %arg12[%c0_46, %c0_47, %c0_48] : memref<1x1x64xf32, #tpu.memory_space<vmem>>, vector<1x1x64xf32>
    %94 = vector.shape_cast %93 : vector<1x1x64xf32> to vector<1x64xf32>
    %95 = vector.broadcast %94 : vector<1x64xf32> to vector<8x64xf32>
    %96 = arith.addf %92, %95 : vector<8x64xf32>
    %cst_49 = arith.constant 0.000000e+00 : f32
    %97 = vector.broadcast %cst_49 : f32 to vector<8x64xf32>
    %98 = arith.maximumf %96, %97 : vector<8x64xf32>
    %c0_50 = arith.constant 0 : index
    %c0_51 = arith.constant 0 : index
    %c0_52 = arith.constant 0 : index
    %99 = vector.load %arg13[%c0_50, %c0_51, %c0_52] : memref<1x64x32xf32, #tpu.memory_space<vmem>>, vector<1x64x32xf32>
    %100 = vector.shape_cast %99 : vector<1x64x32xf32> to vector<64x32xf32>
    %cst_53 = arith.constant dense<0.000000e+00> : vector<8x32xf32>
    %101 = tpu.matmul %98, %100, %cst_53 {dimension_numbers = #tpu.dot_dimension_numbers<[1], [0], [0], [1], [0, 0, 1, 1], [], []>} : vector<8x64xf32>, vector<64x32xf32>, vector<8x32xf32> -> vector<8x32xf32>
    %c0_54 = arith.constant 0 : index
    %c0_55 = arith.constant 0 : index
    %c0_56 = arith.constant 0 : index
    %102 = vector.load %arg14[%c0_54, %c0_55, %c0_56] : memref<1x1x32xf32, #tpu.memory_space<vmem>>, vector<1x1x32xf32>
    %103 = vector.shape_cast %102 : vector<1x1x32xf32> to vector<1x32xf32>
    %104 = vector.broadcast %103 : vector<1x32xf32> to vector<8x32xf32>
    %105 = arith.addf %101, %104 : vector<8x32xf32>
    %106 = arith.addf %89, %105 : vector<8x32xf32>
    %c0_57 = arith.constant 0 : index
    %c0_58 = arith.constant 0 : index
    %c0_59 = arith.constant 0 : index
    %107 = vector.load %arg15[%c0_57, %c0_58, %c0_59] : memref<1x1x32xf32, #tpu.memory_space<vmem>>, vector<1x1x32xf32>
    %108 = vector.shape_cast %107 : vector<1x1x32xf32> to vector<1x32xf32>
    %c0_60 = arith.constant 0 : index
    %c0_61 = arith.constant 0 : index
    %c0_62 = arith.constant 0 : index
    %109 = vector.load %arg16[%c0_60, %c0_61, %c0_62] : memref<1x1x32xf32, #tpu.memory_space<vmem>>, vector<1x1x32xf32>
    %110 = vector.shape_cast %109 : vector<1x1x32xf32> to vector<1x32xf32>
    %cst_63 = arith.constant dense<0.000000e+00> : vector<8xf32>
    %111 = vector.multi_reduction <add>, %106, %cst_63 [1] : vector<8x32xf32> to vector<8xf32>
    %112 = vector.shape_cast %111 : vector<8xf32> to vector<8x1xf32>
    %cst_64 = arith.constant 3.200000e+01 : f32
    %113 = vector.broadcast %cst_64 : f32 to vector<8x1xf32>
    %114 = arith.divf %112, %113 : vector<8x1xf32>
    %115 = vector.broadcast %114 : vector<8x1xf32> to vector<8x32xf32>
    %116 = arith.subf %106, %115 : vector<8x32xf32>
    %117 = arith.mulf %116, %116 : vector<8x32xf32>
    %cst_65 = arith.constant dense<0.000000e+00> : vector<8xf32>
    %118 = vector.multi_reduction <add>, %117, %cst_65 [1] : vector<8x32xf32> to vector<8xf32>
    %119 = vector.shape_cast %118 : vector<8xf32> to vector<8x1xf32>
    %cst_66 = arith.constant 3.200000e+01 : f32
    %120 = vector.broadcast %cst_66 : f32 to vector<8x1xf32>
    %121 = arith.divf %119, %120 : vector<8x1xf32>
    %122 = vector.broadcast %114 : vector<8x1xf32> to vector<8x32xf32>
    %123 = arith.subf %106, %122 : vector<8x32xf32>
    %cst_67 = arith.constant 9.99999997E-7 : f32
    %124 = vector.broadcast %cst_67 : f32 to vector<8x1xf32>
    %125 = arith.addf %121, %124 : vector<8x1xf32>
    %126 = math.rsqrt %125 : vector<8x1xf32>
    %127 = vector.broadcast %126 : vector<8x1xf32> to vector<8x32xf32>
    %128 = arith.mulf %123, %127 : vector<8x32xf32>
    %129 = vector.broadcast %108 : vector<1x32xf32> to vector<8x32xf32>
    %130 = arith.mulf %128, %129 : vector<8x32xf32>
    %131 = vector.broadcast %110 : vector<1x32xf32> to vector<8x32xf32>
    %132 = arith.addf %130, %131 : vector<8x32xf32>
    %c0_68 = arith.constant 0 : index
    %c0_69 = arith.constant 0 : index
    %c0_70 = arith.constant 0 : index
    %133 = vector.load %arg17[%c0_68, %c0_69, %c0_70] : memref<1x8x32xf32, #tpu.memory_space<vmem>>, vector<1x8x32xf32>
    %134 = vector.shape_cast %133 : vector<1x8x32xf32> to vector<8x32xf32>
    %135 = vector.shape_cast %132 : vector<8x32xf32> to vector<1x8x32xf32>
    tpu.vector_store %arg17[%c0_68, %c0_69, %c0_70], %135 {strides = array<i32>} : memref<1x8x32xf32, #tpu.memory_space<vmem>>, vector<1x8x32xf32>,
    return
  }
  func.func @transform_0(%arg0: i32, %arg1: i32) -> (i32, i32, i32) {
    %c0_i32 = arith.constant 0 : i32
    %c0_i32_0 = arith.constant 0 : i32
    %c0_i32_1 = arith.constant 0 : i32
    return %arg0, %c0_i32, %c0_i32_0 : i32, i32, i32
  }
  func.func @transform_1(%arg0: i32, %arg1: i32) -> (i32, i32) {
    %c0_i32 = arith.constant 0 : i32
    %c0_i32_0 = arith.constant 0 : i32
    %c0_i32_1 = arith.constant 0 : i32
    return %c0_i32, %c0_i32_0 : i32, i32
  }
  func.func @transform_2(%arg0: i32, %arg1: i32) -> (i32, i32) {
    %c0_i32 = arith.constant 0 : i32
    %c0_i32_0 = arith.constant 0 : i32
    %c0_i32_1 = arith.constant 0 : i32
    return %c0_i32, %c0_i32_0 : i32, i32
  }
  func.func @transform_3(%arg0: i32, %arg1: i32) -> (i32, i32) {
    %c0_i32 = arith.constant 0 : i32
    %c0_i32_0 = arith.constant 0 : i32
    %c0_i32_1 = arith.constant 0 : i32
    return %c0_i32, %c0_i32_0 : i32, i32
  }
  func.func @transform_4(%arg0: i32, %arg1: i32) -> (i32, i32, i32) {
    %c0_i32 = arith.constant 0 : i32
    %c0_i32_0 = arith.constant 0 : i32
    %c0_i32_1 = arith.constant 0 : i32
    return %arg0, %c0_i32, %c0_i32_0 : i32, i32, i32
  }
  func.func @transform_5(%arg0: i32, %arg1: i32) -> (i32, i32, i32) {
    %c0_i32 = arith.constant 0 : i32
    %c0_i32_0 = arith.constant 0 : i32
    %c0_i32_1 = arith.constant 0 : i32
    return %arg1, %c0_i32, %c0_i32_0 : i32, i32, i32
  }
  func.func @transform_6(%arg0: i32, %arg1: i32) -> (i32, i32, i32) {
    %c0_i32 = arith.constant 0 : i32
    %c0_i32_0 = arith.constant 0 : i32
    %c0_i32_1 = arith.constant 0 : i32
    return %arg1, %c0_i32, %c0_i32_0 : i32, i32, i32
  }
  func.func @transform_7(%arg0: i32, %arg1: i32) -> (i32, i32, i32) {
    %c0_i32 = arith.constant 0 : i32
    %c0_i32_0 = arith.constant 0 : i32
    %c0_i32_1 = arith.constant 0 : i32
    return %arg1, %c0_i32, %c0_i32_0 : i32, i32, i32
  }
  func.func @transform_8(%arg0: i32, %arg1: i32) -> (i32, i32, i32) {
    %c0_i32 = arith.constant 0 : i32
    %c0_i32_0 = arith.constant 0 : i32
    %c0_i32_1 = arith.constant 0 : i32
    return %arg1, %c0_i32, %c0_i32_0 : i32, i32, i32
  }
  func.func @transform_9(%arg0: i32, %arg1: i32) -> (i32, i32, i32) {
    %c0_i32 = arith.constant 0 : i32
    %c0_i32_0 = arith.constant 0 : i32
    %c0_i32_1 = arith.constant 0 : i32
    return %arg1, %c0_i32, %c0_i32_0 : i32, i32, i32
  }
  func.func @transform_10(%arg0: i32, %arg1: i32) -> (i32, i32, i32) {
    %c0_i32 = arith.constant 0 : i32
    %c0_i32_0 = arith.constant 0 : i32
    %c0_i32_1 = arith.constant 0 : i32
    return %arg1, %c0_i32, %c0_i32_0 : i32, i32, i32
  }
  func.func @transform_11(%arg0: i32, %arg1: i32) -> (i32, i32, i32) {
    %c0_i32 = arith.constant 0 : i32
    %c0_i32_0 = arith.constant 0 : i32
    %c0_i32_1 = arith.constant 0 : i32
    return %arg1, %c0_i32, %c0_i32_0 : i32, i32, i32
  }
  func.func @transform_12(%arg0: i32, %arg1: i32) -> (i32, i32, i32) {
    %c0_i32 = arith.constant 0 : i32
    %c0_i32_0 = arith.constant 0 : i32
    %c0_i32_1 = arith.constant 0 : i32
    return %arg1, %c0_i32, %c0_i32_0 : i32, i32, i32
  }
  func.func @transform_13(%arg0: i32, %arg1: i32) -> (i32, i32, i32) {
    %c0_i32 = arith.constant 0 : i32
    %c0_i32_0 = arith.constant 0 : i32
    %c0_i32_1 = arith.constant 0 : i32
    return %arg1, %c0_i32, %c0_i32_0 : i32, i32, i32
  }
  func.func @transform_14(%arg0: i32, %arg1: i32) -> (i32, i32, i32) {
    %c0_i32 = arith.constant 0 : i32
    %c0_i32_0 = arith.constant 0 : i32
    %c0_i32_1 = arith.constant 0 : i32
    return %arg1, %c0_i32, %c0_i32_0 : i32, i32, i32
  }
  func.func @transform_15(%arg0: i32, %arg1: i32) -> (i32, i32, i32) {
    %c0_i32 = arith.constant 0 : i32
    %c0_i32_0 = arith.constant 0 : i32
    %c0_i32_1 = arith.constant 0 : i32
    return %arg0, %c0_i32, %c0_i32_0 : i32, i32, i32
  }
}

</mosaic_0001>

<bundles_post_ra>
// kernel: tpu_custom_call.1
= control target key start
LH: loop header
LB: loop body
LE: loop exit
PB: predicated region body
PF: predicated region fallthrough
CT: control target
= control target key end

     0   :  { %s2472_s0 = inlined_call_operand.hbm [shape: f32[2,8,32], index: 0, kind: input, shape index: {}]   ;;  %s2473_s1 = inlined_call_operand.hbm [shape: f32[8,32], index: 1, kind: input, shape index: {}]   ;;  %s2474_s2 = inlined_call_operand.hbm [shape: f32[1,32], index: 2, kind: input, shape index: {}]   ;;  %s2475_s3 = inlined_call_operand.hbm [shape: f32[1,32], index: 3, kind: input, shape index: {}]   ;;  %s2476_s4 = inlined_call_operand.vmem [shape: f32[2,1,8], index: 4, kind: input, shape index: {}]   ;;  %s2477_s5 = inlined_call_operand.vmem [shape: f32[2,32,96], index: 5, kind: input, shape index: {}]   ;;  %s2478_s6 = inlined_call_operand.vmem [shape: f32[2,32,32], index: 6, kind: input, shape index: {}]   ;;  %s2479_s7 = inlined_call_operand.vmem [shape: f32[2,1,32], index: 7, kind: input, shape index: {}]   ;;  %s2480_s8 = inlined_call_operand.hbm [shape: f32[2,1,32], index: 8, kind: input, shape index: {}]   ;;  %s2481_s9 = inlined_call_operand.vmem [shape: f32[2,32,64], index: 9, kind: input, shape index: {}]   ;;  %s2482_s10 = inlined_call_operand.vmem [shape: f32[2,1,64], index: 10, kind: input, shape index: {}]   ;;  %s2483_s11 = inlined_call_operand.vmem [shape: f32[2,64,32], index: 11, kind: input, shape index: {}]   ;;  %s2484_s12 = inlined_call_operand.vmem [shape: f32[2,1,32], index: 12, kind: input, shape index: {}]   ;;  %s2485_s13 = inlined_call_operand.vmem [shape: f32[2,1,32], index: 13, kind: input, shape index: {}]   ;;  %s2486_s14 = inlined_call_operand.hbm [shape: f32[2,1,32], index: 14, kind: input, shape index: {}]   ;;  %s2487_s15 = inlined_call_operand.hbm [shape: f32[2,8,32], index: 15, kind: output, shape index: {}]  }
   0x1   :  { %2506 = sst [smem:[#allocation34_spill]] %s2472_s0 }
   0x2   :  { %2507 = sst [smem:[#allocation35_spill]] %s2473_s1 }
   0x3   :  { %2508 = sst [smem:[#allocation36_spill]] %s2474_s2 }
   0x4   :  { %2509 = sst [smem:[#allocation37_spill]] %s2475_s3 }
   0x5   :  { %2510 = sst [smem:[#allocation38_spill]] %s2476_s4 }
   0x6   :  { %2511 = sst [smem:[#allocation39_spill]] %s2477_s5 }
   0x7   :  { %2512 = sst [smem:[#allocation40_spill]] %s2478_s6 }
   0x8   :  { %2513 = sst [smem:[#allocation41_spill]] %s2479_s7 }
   0x9   :  { %2514 = sst [smem:[#allocation42_spill]] %s2480_s8 }
   0xa   :  { %2515 = sst [smem:[#allocation43_spill]] %s2481_s9 }
   0xb   :  { %2516 = sst [smem:[#allocation44_spill]] %s2482_s10 }
   0xc   :  { %2517 = sst [smem:[#allocation45_spill]] %s2483_s11 }
   0xd   :  { %2518 = sst [smem:[#allocation46_spill]] %s2484_s12 }
   0xe   :  { %2519 = sst [smem:[#allocation47_spill]] %s2485_s13 }
   0xf   :  { %2520 = sst [smem:[#allocation48_spill]] %s2486_s14 }
  0x10   :  { %2521 = sst [smem:[#allocation49_spill]] %s2487_s15 }
  0x11   :  { %20 = vsyncpa [#allocation4], 0 }
  0x12   :  { %22 = vsyncpa [#allocation4 + $0x1], 0 }
  0x13   :  { %23 = vsyncpa [#allocation7], 0 }
  0x14   :  { %24 = vsyncpa [#allocation10], 0 }
  0x15   :  { %25 = vsyncpa [#allocation5], 0 }
  0x16   :  { %27 = vsyncpa [#allocation5 + $0x1], 0  ;;  %s2055_s18 = smov 0   ;;  %s2057_s19 = smov 0  }
  0x17   :  { %s2059_s20 = smov 0   ;;  %s2061_s21 = smov 0  }
  0x18   :  { %s2063_s22 = smov 0   ;;  %s2065_s23 = smov 0  }
  0x19   :  { %s2067_s24 = smov 0   ;;  %s2069_s25 = smov 0  }
  0x1a   :  { %s2071_s26 = smov 0   ;;  %s2073_s27 = smov 0  }
  0x1b   :  { %s2075_s28 = smov 0  }
  0x1c LB: > { %2522 = sst [smem:[#allocation19_spill]] %s1925_s19  ;;  %s2111_s29 = sadd.s32 4294967295, %s1961_s28   ;;  %s1961_s28 = sphi %s2075_s28, %s33_s28   ;;  %s1957_s27 = sphi %s2073_s27, %s2592_s27   ;;  %s1953_s26 = sphi %s2071_s26, %s2588_s26   ;;  %s1949_s25 = sphi %s2069_s25, %s2587_s25   ;;  %s1945_s24 = sphi %s2067_s24, %s2586_s24   ;;  %s1941_s23 = sphi %s2065_s23, %s2585_s23   ;;  %s1937_s22 = sphi %s2063_s22, %s2591_s22   ;;  %s1933_s21 = sphi %s2061_s21, %s2590_s21   ;;  %s1929_s20 = sphi %s2059_s20, %s2583_s20   ;;  %s1925_s19 = sphi %s2057_s19, %s2582_s19   ;;  %s1921_s18 = sphi %s2055_s18, %s2581_s18  }
  0x1d   : > { %2523 = sst [smem:[#allocation20_spill]] %s1929_s20  ;;  %s1428_s30 = sadd.s32 4294967294, %s1961_s28  }
  0x1e   : > { %2524 = sst [smem:[#allocation21_spill]] %s1933_s21  ;;  %p59_p0 = scmp.ne.s32.totalorder %s1941_s23, %s1937_s22 }
  0x1f   : > { %2525 = sst [smem:[#allocation22_spill]] %s1941_s23  ;;  %p60_p1 = scmp.eq.s32.totalorder %s1961_s28, 0 }
  0x20   : > { %2526 = sst [smem:[#allocation23_spill]] %s1945_s24  ;;  %p65_p2 = scmp.ne.s32.totalorder %s1937_s22, %s1933_s21 }
  0x21   : > { %2527 = sst [smem:[#allocation24_spill]] %s1949_s25  ;;  %p438_p3 = scmp.eq.s32.totalorder %s2111_s29, 3 }
  0x22   : > { %2528 = sst [smem:[#allocation25_spill]] %s1953_s26  ;;  %p2124_p4 = por %p60_p1, %p59_p0 }
  0x23   : > { %2529 = sst [smem:[#allocation26_spill]] %s1957_s27  ;;  %p444_p5 = scmp.eq.s32.totalorder %s1428_s30, 3 }
  0x24   : > { %2530 = sst [smem:[#allocation27_spill]] %s1961_s28  ;;  %p2128_p6 = por %p438_p3, %p59_p0 }
  0x25   : > { %p2135_p7 = por %p444_p5, %p65_p2  ;;  %p2492_p8 = scmp.lt.s32.totalorder %s1961_s28, 4 }
  0x26   : > { %s2532_s13 = scalar_select %p2128_p6, 1, 0 }
  0x27   : > { %s2534_s17 = scalar_select %p2135_p7, 1, 0 }
  0x28   : > { %2533 = sst [smem:[#allocation28_spill]] %s2532_s13  ;;  %s500_s16 = sand.u32 1, %s1961_s28  }
  0x29   : > { %2535 = sst [smem:[#allocation29_spill]] %s2534_s17  ;;  %s502_s11 = sand.u32 1, %s1941_s23  }
  0x2a   : > { %s1434_s12 = sshll.u32 %s502_s11, 3  ;;  %s1435_s30 = sshll.u32 %s1957_s27, 3 }
  0x2b   : > { %s2536_s0 = sld [smem:[#allocation34_spill]]  ;;  %s504_s5 = scalar_lea.vmem [#allocation3], %s1434_s12 }
  0x2c   : > { %s512_s7 = sshll.u32 %s504_s5, 4  ;;  %p1500_p9 = pnand %p2492_p8, %p2124_p4  ;;  %s513_s7 = int_to_ptr.vmem [resolvable:$true] %s512_s7 }
  0x2d   : > { %s2150_s17 = scalar_lea.sflag [#allocation4], %s500_s16  ;;  %p66_p10 = scmp.eq.s32.totalorder %s2111_s29, 0 }
  0x2e   : > { %p1429_p11 = scmp.ge.s32.totalorder %s1961_s28, 1  ;;  %p451_p12 = scmp.lt.s32.totalorder %s1961_s28, 5 }
  0x2f   : > { %s2537_s1 = sld [smem:[#allocation35_spill]]  ;;  %p2164_p13 = por %p66_p10, %p65_p2 }
  0x30   : > { %p2168_p0 = pnand %p1429_p11, %p451_p12  ;;  %s42_s15 = sadd.s32 1, %s1953_s26 }
  0x31   : > { %s508_s13 = scalar_lea.hbm %s2536_s0, %s1435_s30  ;;  %p43_p4 = scmp.ge.s32.totalorder %s42_s15, 2 }
  0x32   : > { %s510_s6 = sshll.u32 %s508_s13, 4  ;;  %p1489_p3 = pneg %p2168_p0  ;;  %s511_s6 = int_to_ptr.hbm [resolvable:$true] %s510_s6 }
  0x33   : > { %1502 = dma.hbm_to_vmem [thread:$0]  (!%p1500_p9), %s511_s6, 128, %s513_s7, %s2150_s17  }
  0x34   : > { %s1963_s7 = smov [#allocation6]   ;;  %p2176_p2 = pnand %p1489_p3, %p66_p10 }
  0x35   : > { %s463_s10 = sshll.u32 %s2537_s1, 4  ;;  %s465_s12 = sshll.u32 %s1963_s7, 4  ;;  %s464_s10 = int_to_ptr.hbm [resolvable:$true] %s463_s10  ;;  %s466_s12 = int_to_ptr.vmem [resolvable:$true] %s465_s12 }
  0x36   : > { %1492 = dma.hbm_to_vmem [thread:$0]  (!%p2176_p2), %s464_s10, 128, %s466_s12, [#allocation7]  }
  0x37   : > { %s245_s16 = sadd.s32 1, %s1929_s20  ;;  %p252_p5 = scmp.ne.s32.totalorder %s1929_s20, %s1925_s19 }
  0x38   : > { %p258_p9 = scmp.ne.s32.totalorder %s1925_s19, %s1921_s18  ;;  %s2594_s15 = smov (%p43_p4, %s42_s15), 0 }
  0x39   : > { %2541 = sst [smem:[#allocation30_spill]] %s2594_s15  ;;  %s2542_s30 = sadd.s32 1, %s1957_s27 }
  0x3a   : > { %s2596_s30 = smov (!%p43_p4, %s2542_s30), %s1957_s27  ;;  %s242_s5 = ssub.s32 %s1953_s26, %s2594_s15 }
  0x3b   : > { %p2197_p11 = por %p252_p5, %p60_p1  ;;  %p47_p12 = scmp.ge.s32.totalorder %s2596_s30, 2 }
  0x3c   : > { %p243_p3 = scmp.eq.s32.totalorder %s242_s5, 0  ;;  %p2203_p8 = por %p258_p9, %p66_p10 }
  0x3d   : > { %s549_s10 = sand.u32 1, %s1929_s20   ;;  %s2598_s30 = smov (%p47_p12, %s2596_s30), 0 }
  0x3e   : > { %2545 = sst [smem:[#allocation31_spill]] %s2598_s30  ;;  %s49_s12 = ssub.s32 %s1957_s27, %s2598_s30 }
  0x3f   : > { %s2211_s7 = scalar_select %p243_p3, %s1929_s20, %s245_s16  }
  0x40   : > { %p50_p1 = scmp.eq.s32.totalorder %s49_s12, 0  ;;  %s2547_s8 = sld [smem:[#allocation42_spill]] }
  0x41   : > { %2546 = sst [smem:[#allocation32_spill]] %s2211_s7  ;;  %s550_s21 = scalar_lea.vmem [#allocation11], %s549_s10 }
  0x42   : > { %s557_s4 = sshll.u32 %s550_s21, 4  ;;  %s2548_s24 = sadd.s32 1, %s1941_s23  ;;  %s558_s4 = int_to_ptr.vmem [resolvable:$true] %s557_s4 }
  0x43   : > { %s2222_s25 = scalar_select %p50_p1, %s1941_s23, %s2548_s24  }
  0x44   : > { %p2550_p4 = scmp.lt.s32.totalorder %s1961_s28, 4  ;;  %s2552_s2 = sld [smem:[#allocation36_spill]] }
  0x45   : > { %2549 = sst [smem:[#allocation33_spill]] %s2222_s25  ;;  %s1964_s21 = smov [#allocation8]  }
  0x46   : > { %s553_s15 = scalar_lea.hbm %s2547_s8, %s1953_s26  ;;  %p2228_p5 = pnand %p2550_p4, %p2197_p11 }
  0x47   : > { %s555_s5 = sshll.u32 %s553_s15, 4  ;;  %s477_s15 = sshll.u32 %s1964_s21, 4  ;;  %s556_s5 = int_to_ptr.hbm [resolvable:$true] %s555_s5  ;;  %s478_s15 = int_to_ptr.vmem [resolvable:$true] %s477_s15 }
  0x48   : > { %1505 = dma.hbm_to_vmem [thread:$0]  (!%p2228_p5), %s556_s5, 16, %s558_s4, %s2150_s17  }
  0x49   : > { %s2553_s3 = sld [smem:[#allocation37_spill]]  ;;  %s1965_s30 = smov [#allocation9]  }
  0x4a   : > { %s475_s1 = sshll.u32 %s2552_s2, 4  ;;  %s489_s27 = sshll.u32 %s1965_s30, 4  ;;  %s476_s1 = int_to_ptr.hbm [resolvable:$true] %s475_s1  ;;  %s490_s27 = int_to_ptr.vmem [resolvable:$true] %s489_s27 }
  0x4b   : > { %1495 = dma.hbm_to_vmem [thread:$0]  (!%p2176_p2), %s476_s1, 16, %s478_s15, [#allocation7]  }
  0x4c   : > { %s2554_s14 = sld [smem:[#allocation48_spill]]  ;;  %s601_s25 = scalar_lea.vmem [#allocation12], %s549_s10 }
  0x4d   : > { %s608_s4 = sshll.u32 %s601_s25, 4  ;;  %s619_s30 = sand.u32 (!%p2168_p0), 1, %s2111_s29   ;;  %s609_s4 = int_to_ptr.vmem [resolvable:$true] %s608_s4 }
  0x4e   : > { %s2499_s5 = sand.u32 (!%p2168_p0), 1, %s1937_s22  }
  0x4f   : > { %s487_s8 = sshll.u32 %s2553_s3, 4  ;;  %s2258_s1 = sshll.u32 (!%p2168_p0), %s2499_s5, 3  ;;  %s488_s8 = int_to_ptr.hbm [resolvable:$true] %s487_s8 }
  0x50   : > { %1498 = dma.hbm_to_vmem [thread:$0]  (!%p2176_p2), %s488_s8, 16, %s490_s27, [#allocation10]  }
  0x51   : > { %617 = sbr.rel (%p2168_p0) target bundleno = 2198 (0x896), region = 80  ;;  %s623_s8 = scalar_lea.vmem (!%p2168_p0), [#allocation3], %s2258_s1 }
  0x52   : > { %s604_s2 = scalar_lea.hbm %s2554_s14, %s1953_s26 }
  0x53   : > { %s606_s21 = sshll.u32 %s604_s2, 4  ;;  %s620_s2 = scalar_lea.sflag (!%p2168_p0), [#allocation4], %s619_s30  ;;  %s607_s21 = int_to_ptr.hbm [resolvable:$true] %s606_s21 }
  0x54   : > { %1508 = dma.hbm_to_vmem [thread:$0]  (!%p2228_p5), %s607_s21, 16, %s609_s4, %s2150_s17  }
  0x56   : > { %1900 = dma.done.wait (%p2164_p13), %s620_s2, 128  }
  0x57   : > { %1902 = vsyncadd (%p2164_p13), %s620_s2, 4294967168 }
  0x58   : > { %1904 = dma.done.wait (%p66_p10), [#allocation7], 144  }
  0x59   : > { %1906 = vsyncadd (%p66_p10), [#allocation7], 4294967152 }
  0x5a   : > { %1908 = dma.done.wait (%p66_p10), [#allocation10], 16  }
  0x5b   : > { %1910 = vsyncadd (%p66_p10), [#allocation10], 4294967280  ;;  %s646_s25 = sand.u32 1, %s1925_s19  }
  0x5c   : > { %s2274_s27 = scalar_lea.vmem [#allocation11], %s646_s25 }
  0x5d   : > { %1912 = dma.done.wait (%p2203_p8), %s620_s2, 32  }
  0x5e   : > { %1914 = vsyncadd (%p2203_p8), %s620_s2, 4294967264  ;;  %s2555_s17 = sld [smem:[#allocation24_spill]]  ;;  %s2330_s14 = scalar_lea.vmem [#allocation12], %s646_s25 }
  0x5f   : > { %s2556_s11 = sld [smem:[#allocation23_spill]] }
  0x60   : > { %s2559_s4 = sld [smem:[#allocation39_spill]] }
  0x61   : > { %s2560_s6 = sld [smem:[#allocation40_spill]] }
  0x62   : > { %s2561_s26 = sld [smem:[#allocation43_spill]] }
  0x63   : > { %s2562_s7 = sld [smem:[#allocation44_spill]] }
  0x64   : > { %p747_p13 = scmp.lt.s32.totalorder %s2555_s17, 1  ;;  %s2563_s0 = sld [smem:[#allocation46_spill]] }
  0x65   : > { %p750_p0 = scmp.lt.s32.totalorder %s2556_s11, 1  ;;  %s2564_s19 = sld [smem:[#allocation45_spill]] }
  0x66   : > { %s2600_s17 = smov (!%p747_p13, %s2555_s17), 1  ;;  %s2565_s28 = sld [smem:[#allocation47_spill]] }
  0x67   : > { %s2286_s29 = scalar_select %p750_p0, %s2556_s11, 1 }
  0x68   : > { %p1450_p8 = scmp.ne.s32.totalorder %s2556_s11, 0 }
  0x69   : > { %s1465_s16 = sshll.u32 %s2286_s29, 5  ;;  %s770_s15 = scalar_lea.vmem %s2562_s7, %s2286_s29 }
  0x6a   : > { %s2300_s30 = scalar_lea.vmem %s2559_s4, %s1465_s16  ;;  %s2305_s13 = scalar_lea.vmem %s2560_s6, %s1465_s16 }
  0x6b   : > { %s2310_s23 = scalar_lea.vmem %s2561_s26, %s1465_s16  ;;  %s1468_s24 = sshll.u32 %s2286_s29, 6 }
  0x6c   : > { %s778_s21 = scalar_lea.vmem %s2563_s0, %s2286_s29  ;;  %s2324_s5 = scalar_lea.vmem %s2564_s19, %s1468_s24 }
  0x6d   : > { %s781_s3 = scalar_lea.vmem %s2565_s28, %s2286_s29  ;;  %s2333_s26 = scalar_lea.vmem [#allocation13], %s2258_s1 }
  0x6e   : > { %785 = sbr.rel (%p1450_p8) target bundleno = 387 (0x183), region = 108 }
  0x73   : > { %v786_v0 = vld [vmem:[%s623_s8] sm:$0xff]  ;;  %v787_v1 = vld [vmem:[#allocation6] sm:$0xff]  ;;  %vm791_vm0 = vcmask 261120   ;;  %v1966_v4 = vmov 32.0   ;;  %v1621_v25 = vld [vmem:[#allocation8] ss:$0 sm:$0xff] }
  0x74   : > { %v788_v2 = vadd.f32 %v787_v1, %v786_v0  ;;  %1623 = vrcp.f32 %v1966_v4  ;;  %v1622_v27 = vld [vmem:[#allocation9] ss:$0 sm:$0xff] }
  0x76   : > { %v792_v3 = vsel %vm791_vm0, %v788_v2, 0.0 }
  0x77   : > { %793 = vadd.xlane.f32.xlu0 %v792_v3 }
  0x7a   : > { %v1624_v5 = vpop.eup %1623 }
  0x7b   : > { %v796_v6 = vmul.f32 32.0, %v1624_v5  ;;  %vm800_vm1 = vweird.f32 %v1624_v5 }
  0x7d   : > { %v797_v7 = vsub.f32 1.0, %v796_v6 }
  0x7f   : > { %v798_v8 = vmul.f32 %v1624_v5, %v797_v7 }
  0x81   : > { %v799_v9 = vadd.f32 %v1624_v5, %v798_v8 }
  0x83   : > { %v801_v10 = vsel %vm800_vm1, %v1624_v5, %v799_v9 }
  0xea   : > { %v794_v11 = vpop.xlane.xlu0 %793 }
  0xeb   : > { %v802_v12 = vmul.f32 %v801_v10, %v794_v11 }
  0xed   : > { %v803_v13 = vsub.f32 %v788_v2, %v802_v12 }
  0xef   : > { %v804_v14 = vmul.f32 %v803_v13, %v803_v13 }
  0xf1   : > { %v805_v15 = vsel %vm791_vm0, %v804_v14, 0.0 }
  0xf2   : > { %806 = vadd.xlane.f32.xlu0 %v805_v15 }
 0x165   : > { %v807_v16 = vpop.xlane.xlu0 %806 }
 0x166   : > { %v808_v17 = vmul.f32 %v807_v16, %v801_v10 }
 0x168   : > { %v809_v18 = vadd.f32 1e-09, %v808_v17 }
 0x16a   : > { %1625 = vrsqrt.f32 %v809_v18  ;;  %vm816_vm3 = vweird.f32 %v809_v18 }
 0x170   : > { %v1626_v19 = vpop.eup %1625 }
 0x171   : > { %v811_v20 = vmul.f32 %v1626_v19, %v809_v18  ;;  %vm817_vm2 = vweird.f32 %v1626_v19 }
 0x172   : > { %vm818_vm4 = vmor %vm816_vm3, %vm817_vm2 }
 0x173   : > { %v812_v21 = vmul.f32 %v1626_v19, %v811_v20 }
 0x175   : > { %v813_v22 = vmul.f32 0.5, %v812_v21 }
 0x177   : > { %v814_v23 = vsub.f32 1.5, %v813_v22 }
 0x179   : > { %v815_v24 = vmul.f32 %v1626_v19, %v814_v23 }
 0x17b   : > { %v819_v26 = vsel %vm818_vm4, %v1626_v19, %v815_v24 }
 0x17c   : > { %v820_v28 = vmul.f32 %v819_v26, %v803_v13 }
 0x17e   : > { %v824_v29 = vmul.f32 %v1621_v25, %v820_v28 }
 0x180   : > { %v828_v30 = vadd.f32 %v1622_v27, %v824_v29 }
 0x182   : > { %829 = vst.msk [vmem:[%s2333_s26] sm:$0xff] %vm791_vm0, %v828_v30 }
 0x183 PF: > { %v835_v31 = vld [vmem:[%s2300_s30 + $0x18] sm:$0xff]  ;;  %v834_v32 = vld [vmem:[%s2300_s30 + $0x10] sm:$0xff]  ;;  %v833_v33 = vld [vmem:[%s2300_s30 + $0x8] sm:$0xff]  ;;  %vm836_vm5 = vcmask 261120   ;;  %s1967_s19 = smov 96   ;;  %s1968_s20 = smov 112  }
 0x184   : > { %852 = vmatpush.msra.mxu0 %v835_v31  ;;  %v832_v34 = vld [vmem:[%s2300_s30] sm:$0xff]  ;;  %s1969_s28 = smov 80   ;;  %vm864_vm6 = vcmask 130048   ;;  %s2566_s8 = sld [smem:[#allocation38_spill]]  ;;  %v1970_v42 = vmov 0   ;;  %vm895_vm9 = vcmask 64512  }
 0x185   : > { %s1972_s11 = smov 48   ;;  %s1973_s18 = smov 16   ;;  %v1010_v7 = vld [vmem:[%s2305_s13 + $0x18] sm:$0xff]  ;;  %v1009_v8 = vld [vmem:[%s2305_s13 + $0x10] sm:$0xff]  ;;  %v1008_v9 = vld [vmem:[%s2305_s13 + $0x8] sm:$0xff]  ;;  %vm1004_vm10 = vcmask 261248  }
 0x186   : > { %853 = vmatpush.msra.mxu0 %v834_v32  ;;  %v1007_v10 = vld [vmem:[%s2305_s13] sm:$0xff]  ;;  %v1974_v16 = vmov 32.0   ;;  %v1077_v28 = vld [vmem:[%s2310_s23 + $0x18] sm:$0xff]  ;;  %v1076_v29 = vld [vmem:[%s2310_s23 + $0x10] sm:$0xff]  ;;  %s2568_s12 = sld [smem:[#allocation41_spill]]  ;;  %vm1118_vm15 = vcmask 523264  }
 0x187   : > { %v1075_v30 = vld [vmem:[%s2310_s23 + $0x8] sm:$0xff]  ;;  %v1074_v31 = vld [vmem:[%s2310_s23] sm:$0xff]  ;;  %v1113_v32 = vld [vmem:[%s2324_s5 + $0x38] sm:$0xff]  ;;  %s2572_s4 = sld [smem:[#allocation24_spill]] }
 0x188   : > { %854 = vmatpush.msra.mxu0 %v833_v33  ;;  %v1112_v33 = vld [vmem:[%s2324_s5 + $0x30] sm:$0xff] }
 0x189   : > { %v2345_v35 = vld [vmem:[%s2333_s26] sm:$0xff] }
 0x18a   : > { %855 = vmatpush.msra.mxu0 %v832_v34  ;;  %s2567_s25 = scalar_lea.vmem %s2566_s8, %s2600_s17  ;;  %s1971_s17 = smov 64   ;;  %v1111_v34 = vld [vmem:[%s2324_s5 + $0x28] sm:$0xff] }
 0x18b   : > { %1451 = vmatmul.msk.f32.vlgmr.msra.gmra.mxu0 %vm836_vm5, %v2345_v35  ;;  %v831_v41 = vld [vmem:[%s2567_s25] sm:$0x1]  ;;  %s1189_s8 = sshll.u32 %s2333_s26, 4  ;;  %s1190_s8 = int_to_ptr.vmem [resolvable:$true] %s1189_s8 }
 0x18c   : > { %vm890_vm7 = vcmp.gt.f32.partialorder %v831_v41, 0.0  ;;  %1130 = vmatpush.msrb.mxu0 %v1113_v32  ;;  %s2569_s30 = scalar_lea.vmem %s2568_s12, %s2286_s29 }
 0x18d   : > { %v891_v43 = vsel %vm890_vm7, 1, %v1970_v42 }
 0x18e   : > { %v892_v44 = vperm.slane %v891_v43, 0  ;;  %1131 = vmatpush.msrb.mxu0 %v1112_v33 }
 0x190   : > { %vm893_vm8 = vcmp.eq.s32.totalorder %v892_v44, 1  ;;  %1132 = vmatpush.msrb.mxu0 %v1111_v34 }
 0x208   : > { %v857_v36 = vpop.f32.mrf.mxu0 }
 0x209   : > { %862 = vrot.lane.b32.xlu0 %v857_v36, %s1967_s19  ;;  %v860_v37 = vmul.f32 0.25, %v857_v36 }
 0x20b   : > { %934 = vrot.lane.b32.xlu1 %v860_v37, %s1968_s20  ;;  %s2574_s20 = sld [smem:[#allocation49_spill]] }
 0x211   : > { %936 = vrot.lane.b32.xlu0 %v857_v36, %s1969_s28  ;;  %s2575_s7 = smov %s2574_s20 }
 0x27b   : > { %v863_v38 = vpop.permute.xlu0 %862 }
 0x27c   : > { %1452 = vmatpush.xpose.msk.msra.mxu1 %vm864_vm6, %v863_v38 }
 0x27d   : > { %v935_v40 = vpop.permute.xlu1 %934 }
 0x27f   : > { %1453 = vmatmul.msk.f32.vlgmr.msra.gmra.mxu1 %vm864_vm6, %v860_v37  ;;  %v1110_v37 = vld [vmem:[%s2324_s5 + $0x20] sm:$0xff] }
 0x280   : > { %1026 = vmatpush.msrb.mxu1 %v1010_v7  ;;  %1133 = vmatpush.msrb.mxu0 %v1110_v37 }
 0x282   : > { %1027 = vmatpush.msrb.mxu1 %v1009_v8 }
 0x283   : > { %v937_v39 = vpop.permute.xlu0 %936 }
 0x284   : > { %1455 = vmatpush.xpose.msk.msra.mxu3 %vm864_vm6, %v937_v39  ;;  %1028 = vmatpush.msrb.mxu1 %v1008_v9  ;;  %v1109_v39 = vld [vmem:[%s2324_s5 + $0x18] sm:$0xff] }
 0x285   : > { %1134 = vmatpush.msrb.mxu0 %v1109_v39 }
 0x286   : > { %1029 = vmatpush.msrb.mxu1 %v1007_v10 }
 0x287   : > { %1456 = vmatmul.msk.f32.vlgmr.msra.gmra.mxu3 %vm864_vm6, %v935_v40 }
 0x288   : > { %1097 = vmatpush.msrb.mxu3 %v1077_v28 }
 0x28a   : > { %1098 = vmatpush.msrb.mxu3 %v1076_v29 }
 0x28c   : > { %1099 = vmatpush.msrb.mxu3 %v1075_v30 }
 0x28e   : > { %1100 = vmatpush.msrb.mxu3 %v1074_v31 }
 0x2fc   : > { %v887_v45 = vpop.f32.mrf.mxu1 }
 0x2fd   : > { %v894_v46 = vsel %vm893_vm8, %v887_v45, -1e+09 }
 0x2fe   : > { %v896_v47 = vsel %vm895_vm9, %v894_v46, -inf }
 0x2ff   : > { %897 = vmax.xlane.f32.xlu1 %v896_v47 }
 0x30a   : > { %v959_v48 = vpop.f32.mrf.mxu3 }
 0x30b   : > { %v962_v49 = vsel %vm893_vm8, %v959_v48, -1e+09 }
 0x30c   : > { %v963_v50 = vsel %vm895_vm9, %v962_v49, -inf }
 0x30d   : > { %964 = vmax.xlane.f32.xlu2 %v963_v50 }
 0x372   : > { %v898_v51 = vpop.xlane.xlu1 %897 }
 0x373   : > { %v899_v52 = vsub.f32 %v894_v46, %v898_v51  ;;  %v1627_v46 = vld [vmem:[%s2569_s30] ss:$0 sm:$0xff] }
 0x375   : > { %v900_v53 = vmul.f32 1.442695, %v899_v52  ;;  %v1108_v52 = vld [vmem:[%s2324_s5 + $0x10] sm:$0xff] }
 0x376   : > { %1135 = vmatpush.msrb.mxu0 %v1108_v52 }
 0x377   : > { %1633 = vpow2.f32 %v900_v53  ;;  %v1107_v53 = vld [vmem:[%s2324_s5 + $0x8] sm:$0xff] }
 0x378   : > { %1136 = vmatpush.msrb.mxu0 %v1107_v53 }
 0x37d   : > { %v1634_v54 = vpop.eup %1633 }
 0x37e   : > { %v902_v55 = vsel %vm895_vm9, %v1634_v54, 0.0 }
 0x37f   : > { %903 = vadd.xlane.f32.xlu2 %v902_v55  ;;  %v1629_v55 = vld [vmem:[%s770_s15] ss:$0 sm:$0xff]  ;;  %s1462_s15 = sshll.u32 %s2572_s4, 3 }
 0x380   : > { %v965_v56 = vpop.xlane.xlu2 %964  ;;  %s1187_s28 = scalar_lea.hbm %s2574_s20, %s1462_s15 }
 0x381   : > { %v966_v57 = vsub.f32 %v962_v49, %v965_v56  ;;  %v1628_v49 = vld [vmem:[%s2274_s27] ss:$0 sm:$0xff]  ;;  %s1191_s25 = sshll.u32 %s1187_s28, 4  ;;  %s1192_s25 = int_to_ptr.hbm [resolvable:$true] %s1191_s25 }
 0x382   : > { %s1841_s29 = sshra.s32 %s1192_s25, 4  ;;  %s1842_s29 = int_to_ptr.hbm [resolvable:$true] %s1841_s29 }
 0x383   : > { %v967_v58 = vmul.f32 1.442695, %v966_v57  ;;  %p1848_p11 = scmp.lt.s32.totalorder %s1842_s29, %s2575_s7 }
 0x385   : > { %1635 = vpow2.f32 %v967_v58 }
 0x38b   : > { %v1636_v59 = vpop.eup %1635 }
 0x38c   : > { %v969_v60 = vsel %vm895_vm9, %v1636_v59, 0.0 }
 0x38d   : > { %970 = vadd.xlane.f32.xlu0 %v969_v60 }
 0x397   : > { %907 = vrot.lane.b32.xlu2 %v857_v36, %s1971_s17  ;;  %s2577_s17 = sand.u32 1, %s1937_s22  }
 0x39f   : > { %974 = vrot.lane.b32.xlu2 %v857_v36, %s1972_s11  ;;  %s1177_s11 = scalar_lea.sflag [#allocation5], %s2577_s17 }
 0x3f2   : > { %v904_v61 = vpop.xlane.xlu2 %903 }
 0x3f3   : > { %1637 = vrcp.f32 %v904_v61 }
 0x3f9   : > { %v1638_v62 = vpop.eup %1637 }
 0x3fa   : > { %v908_v63 = vpop.permute.xlu2 %907  ;;  %v906_v0 = vmul.f32 %v1638_v62, %v1634_v54  ;;  %v1106_v54 = vld [vmem:[%s2324_s5] sm:$0xff] }
 0x3fb   : > { %928 = vmatpush.msra.mxu2 %v908_v63  ;;  %1137 = vmatpush.msrb.mxu0 %v1106_v54 }
 0x3fc   : > { %1454 = vmatmul.msk.f32.vlgmr.msra.gmra.mxu2 %vm895_vm9, %v906_v0 }
 0x400   : > { %v971_v1 = vpop.xlane.xlu0 %970 }
 0x401   : > { %1639 = vrcp.f32 %v971_v1 }
 0x402   : > { %v975_v2 = vpop.permute.xlu2 %974  ;;  %1641 = vrcp.f32 %v1974_v16 }
 0x403   : > { %995 = vmatpush.msrb.mxu2 %v975_v2 }
 0x407   : > { %v1640_v3 = vpop.eup %1639 }
 0x408   : > { %v973_v4 = vmul.f32 %v1640_v3, %v1636_v59  ;;  %v1642_v17 = vpop.eup %1641  ;;  %v1630_v59 = vld [vmem:[%s778_s21] ss:$0 sm:$0xff] }
 0x409   : > { %v1041_v18 = vmul.f32 32.0, %v1642_v17  ;;  %vm1045_vm11 = vweird.f32 %v1642_v17 }
 0x40a   : > { %1457 = vmatmul.msk.f32.vlgmr.msrb.gmra.mxu2 %vm895_vm9, %v973_v4 }
 0x40b   : > { %v1042_v19 = vsub.f32 1.0, %v1041_v18 }
 0x40d   : > { %v1043_v20 = vmul.f32 %v1642_v17, %v1042_v19 }
 0x40f   : > { %v1044_v21 = vadd.f32 %v1642_v17, %v1043_v20 }
 0x411   : > { %v2372_v22 = vsel %vm1045_vm11, %v1642_v17, %v1044_v21  ;;  %v1632_v17 = vld [vmem:[%s2330_s14] ss:$0 sm:$0xff]  ;;  %s1847_s14 = scalar_lea.hbm %s2575_s7, 16 }
 0x47f   : > { %v930_v5 = vpop.f32.mrf.mxu2 }
 0x480   : > { %933 = vst.msk [vmem:[#allocation2] sm:$0xff] %vm864_vm6, %v930_v5 }
 0x48d   : > { %v997_v6 = vpop.f32.mrf.mxu2 }
 0x48e   : > { %1001 = vrot.lane.b32.xlu2 %v997_v6, %s1973_s18 }
 0x4e8   : > { %v1002_v11 = vpop.permute.xlu2 %1001 }
 0x4e9   : > { %1005 = vst.msk [vmem:[#allocation2] sm:$0xff] %vm1004_vm10, %v1002_v11 }
 0x4f0   : > { %v1006_v12 = vld [vmem:[#allocation2] sm:$0xff] }
 0x4f1   : > { %1458 = vmatmul.msk.f32.vlgmr.msrb.gmra.mxu1 %vm836_vm5, %v1006_v12 }
 0x56e   : > { %v1031_v13 = vpop.f32.mrf.mxu1 }
 0x56f   : > { %v1034_v14 = vadd.f32 %v1031_v13, %v2345_v35 }
 0x571   : > { %v1037_v15 = vsel %vm836_vm5, %v1034_v14, 0.0 }
 0x572   : > { %1038 = vadd.xlane.f32.xlu1 %v1037_v15 }
 0x5e5   : > { %v1039_v23 = vpop.xlane.xlu1 %1038 }
 0x5e6   : > { %v1047_v24 = vmul.f32 %v2372_v22, %v1039_v23 }
 0x5e8   : > { %v1048_v25 = vsub.f32 %v1034_v14, %v1047_v24  ;;  %v1631_v14 = vld [vmem:[%s781_s3] ss:$0 sm:$0xff]  ;;  %s1843_s3 = scalar_lea.hbm %s1842_s29, 8 }
 0x5e9   : > { %p1844_p10 = scmp.ne.s32.totalorder %s1842_s29, %s1843_s3  ;;  %p1849_p12 = scmp.lt.s32.totalorder %s1847_s14, %s1843_s3 }
 0x5ea   : > { %v1049_v26 = vmul.f32 %v1048_v25, %v1048_v25 }
 0x5eb   : > { %p1845_p2 = pnand %p1844_p10, %p2128_p6  ;;  %p1850_p3 = por %p1849_p12, %p1848_p11 }
 0x5ec   : > { %v1050_v27 = vsel %vm836_vm5, %v1049_v26, 0.0 }
 0x5ed   : > { %1051 = vadd.xlane.f32.xlu2 %v1050_v27  ;;  %p1846_p9 = pneg %p1845_p2 }
 0x5ef   : > { %p1851_p1 = pnand %p1850_p3, %p1846_p9 }
 0x660   : > { %v1052_v35 = vpop.xlane.xlu2 %1051 }
 0x661   : > { %v1053_v36 = vmul.f32 %v1052_v35, %v2372_v22 }
 0x663   : > { %v1054_v38 = vadd.f32 1e-06, %v1053_v36 }
 0x665   : > { %1643 = vrsqrt.f32 %v1054_v38  ;;  %vm1061_vm13 = vweird.f32 %v1054_v38 }
 0x66b   : > { %v1644_v40 = vpop.eup %1643 }
 0x66c   : > { %v1056_v41 = vmul.f32 %v1644_v40, %v1054_v38  ;;  %vm1062_vm12 = vweird.f32 %v1644_v40 }
 0x66d   : > { %vm1063_vm14 = vmor %vm1061_vm13, %vm1062_vm12 }
 0x66e   : > { %v1057_v42 = vmul.f32 %v1644_v40, %v1056_v41 }
 0x670   : > { %v1058_v43 = vmul.f32 0.5, %v1057_v42 }
 0x672   : > { %v1059_v44 = vsub.f32 1.5, %v1058_v43 }
 0x674   : > { %v1060_v45 = vmul.f32 %v1644_v40, %v1059_v44 }
 0x676   : > { %v1064_v47 = vsel %vm1063_vm14, %v1644_v40, %v1060_v45 }
 0x677   : > { %v1065_v48 = vmul.f32 %v1064_v47, %v1048_v25 }
 0x679   : > { %v1069_v50 = vmul.f32 %v1627_v46, %v1065_v48 }
 0x67b   : > { %v1073_v51 = vadd.f32 %v1628_v49, %v1069_v50 }
 0x67d   : > { %1459 = vmatmul.msk.f32.vlgmr.msrb.gmra.mxu3 %vm836_vm5, %v1073_v51 }
 0x700   : > { %v1102_v56 = vpop.f32.mrf.mxu3 }
 0x701   : > { %v1103_v57 = vadd.f32 %v1629_v55, %v1102_v56 }
 0x703   : > { %v1105_v58 = vmax.f32 %v1103_v57, 0.0 }
 0x705   : > { %1460 = vmatmul.msk.f32.vlgmr.msrb.gmra.mxu0 %vm1118_vm15, %v1105_v58 }
 0x782   : > { %v1139_v60 = vpop.f32.mrf.mxu0 }
 0x783   : > { %v1140_v61 = vadd.f32 %v1630_v59, %v1139_v60 }
 0x785   : > { %v1142_v62 = vadd.f32 %v1140_v61, %v1073_v51 }
 0x787   : > { %v1145_v63 = vsel %vm836_vm5, %v1142_v62, 0.0 }
 0x788   : > { %1146 = vadd.xlane.f32.xlu0 %v1145_v63 }
 0x7fb   : > { %v1147_v0 = vpop.xlane.xlu0 %1146 }
 0x7fc   : > { %v1148_v1 = vmul.f32 %v1147_v0, %v2372_v22 }
 0x7fe   : > { %v1149_v2 = vsub.f32 %v1142_v62, %v1148_v1 }
 0x800   : > { %v1150_v3 = vmul.f32 %v1149_v2, %v1149_v2 }
 0x802   : > { %v1151_v4 = vsel %vm836_vm5, %v1150_v3, 0.0 }
 0x803   : > { %1152 = vadd.xlane.f32.xlu1 %v1151_v4 }
 0x876   : > { %v1153_v5 = vpop.xlane.xlu1 %1152 }
 0x877   : > { %v1154_v6 = vmul.f32 %v1153_v5, %v2372_v22 }
 0x879   : > { %v1155_v7 = vadd.f32 1e-06, %v1154_v6 }
 0x87b   : > { %1645 = vrsqrt.f32 %v1155_v7  ;;  %vm1162_vm1 = vweird.f32 %v1155_v7 }
 0x881   : > { %v1646_v8 = vpop.eup %1645 }
 0x882   : > { %v1157_v9 = vmul.f32 %v1646_v8, %v1155_v7  ;;  %vm1163_vm0 = vweird.f32 %v1646_v8 }
 0x883   : > { %vm1164_vm2 = vmor %vm1162_vm1, %vm1163_vm0 }
 0x884   : > { %v1158_v10 = vmul.f32 %v1646_v8, %v1157_v9 }
 0x886   : > { %v1159_v11 = vmul.f32 0.5, %v1158_v10 }
 0x888   : > { %v1160_v12 = vsub.f32 1.5, %v1159_v11 }
 0x88a   : > { %v1161_v13 = vmul.f32 %v1646_v8, %v1160_v12 }
 0x88c   : > { %v1165_v15 = vsel %vm1164_vm2, %v1646_v8, %v1161_v13 }
 0x88d   : > { %v1166_v16 = vmul.f32 %v1165_v15, %v1149_v2 }
 0x88f   : > { %v1170_v18 = vmul.f32 %v1631_v14, %v1166_v16 }
 0x891   : > { %v1174_v19 = vadd.f32 %v1632_v17, %v1170_v18 }
 0x893   : > { %1175 = vst.msk [vmem:[%s2333_s26] sm:$0xff] %vm836_vm5, %v1174_v19 }
 0x894   : > { %1854 = shalt.err (!%p1851_p1)
}
 0x895   : > { %1487 = dma.vmem_to_hbm [thread:$0]  (%p2128_p6), %s1190_s8, 128, %s1192_s25, %s1177_s11  }
 0x896 PF: > { %s2578_s26 = sld [smem:[#allocation27_spill]] }
 0x897   : > { %s2579_s30 = sld [smem:[#allocation21_spill]] }
 0x89c   : > { %p1520_p4 = scmp.ge.s32.totalorder %s2578_s26, 2 }
 0x89d   : > { %s1203_s10 = sand.u32 1, %s2579_s30  }
 0x89e   : > { %p1510_p5 = pnand %p1520_p4, %p2135_p7  ;;  %s1204_s24 = scalar_lea.sflag [#allocation5], %s1203_s10 }
 0x8a0   : > { %p1511_p13 = pneg %p1510_p5 }
 0x8a2   : > { %1916 = dma.done.wait (%p1511_p13), %s1204_s24, 128  }
 0x8a3   : > { %1918 = vsyncadd (%p1511_p13), %s1204_s24, 4294967168  ;;  %s33_s28 = sadd.s32 1, %s2578_s26   ;;  %s2581_s18 = sld [smem:[#allocation19_spill]] }
 0x8a4   : > { %p30_p0 = scmp.ge.s32.totalorder %s33_s28, 6   ;;  %s2582_s19 = sld [smem:[#allocation20_spill]] }
 0x8a5   : > { %s2583_s20 = sld [smem:[#allocation32_spill]]  ;;  %s2590_s21 = smov %s1937_s22 }
 0x8a6   : > { %s2584_s27 = sld [smem:[#allocation22_spill]] }
 0x8a7   : > { %s2585_s23 = sld [smem:[#allocation33_spill]] }
 0x8a8   : > { %s2586_s24 = sld [smem:[#allocation25_spill]] }
 0x8a9   : > { %s2587_s25 = sld [smem:[#allocation26_spill]] }
 0x8aa   : > { %s2588_s26 = sld [smem:[#allocation30_spill]] }
 0x8ab   : > { %s2589_s9 = sld [smem:[#allocation31_spill]] }
 0x8ac   : > { %s2591_s22 = smov %s2584_s27 }
 0x8ad   :  { %32 = sbr.rel (!%p30_p0) target bundleno = 28 (0x1c), region = 190 }
 0x8b1   : > { %s2592_s27 = smov %s2589_s9 }
 0x8b2   :  { %1210 = vsyncpa [#allocation4], 1 }
 0x8b3   :  { %1212 = vsyncpa [#allocation4 + $0x1], 1 }
 0x8b4   :  { %1213 = vsyncpa [#allocation7], 1 }
 0x8b5   :  { %1214 = vsyncpa [#allocation10], 1 }
 0x8b6   :  { %1215 = vsyncpa [#allocation5], 1 }
 0x8b7   :  { %1217 = vsyncpa [#allocation5 + $0x1], 1 }

</bundles_post_ra>
